<compile_context>
chip_gen: v7x
topology: tpu7x:2x2x1
jax: 0.10.0
libtpu: 0.0.40
codegen_flags: <defaults>
</compile_context>

<pallas_src>
import functools

import jax
import jax.numpy as jnp
from jax.experimental import pallas as pl
from jax.experimental.pallas import tpu as pltpu


def completion_kernel(adj_ref, x_ref, invdeg_ref, mask_ref, xpass_ref,
                      w_ref, b_ref, o_ref, acc_ref, *, batch, feat):
    """One (row-tile, k-tile) grid step of the completion expert.

    adj_ref   : (tile_n, tile_k)  adjacency tile (compute dtype, 0/1)
    x_ref     : (tile_k, B*F)     features, batch folded into lanes (compute)
    invdeg_ref: (tile_n, 1)       precomputed 1/deg (f32)
    mask_ref  : (tile_n, B)       1.0 where the node is unknown (f32)
    xpass_ref : (tile_n, B*F)     exact pass-through features (f32)
    w_ref     : (F, F)            shared linear weights (compute dtype)
    b_ref     : (1, F)            bias (f32)
    o_ref     : (tile_n, B*F)     output (f32)
    acc_ref   : (tile_n, B*F)     f32 VMEM accumulator
    """
    k = pl.program_id(1)

    @pl.when(k == 0)
    def _():
        acc_ref[...] = jnp.zeros_like(acc_ref)

    # MXU: binary adjacency tile x lane-dense feature slab, f32 accumulation.
    acc_ref[...] += jnp.dot(adj_ref[...], x_ref[...],
                            preferred_element_type=jnp.float32)

    @pl.when(k == pl.num_programs(1) - 1)
    def _():
        # Mean aggregation: scale rows by the precomputed 1/deg (lane bcast).
        agg = acc_ref[...] * invdeg_ref[...]
        w = w_ref[...]
        bias = b_ref[...]
        mask = mask_ref[...]
        outs = []
        for bb in range(batch):                       # static unroll, B small
            lo = bb * feat
            a_b = agg[:, lo:lo + feat].astype(w.dtype)
            h_b = jnp.dot(a_b, w, preferred_element_type=jnp.float32)
            h_b = jnp.maximum(h_b + bias, 0.0)
            m_b = mask[:, bb:bb + 1] > 0.0            # (tile_n, 1) lane bcast
            x_b = xpass_ref[:, lo:lo + feat]
            outs.append(jnp.where(m_b, h_b, x_b))
        # One lane-dense store of the whole (tile_n, B*F) slab.
        o_ref[...] = jnp.concatenate(outs, axis=-1).astype(o_ref.dtype)


def _pick_tiles(n, tile_n, tile_k):
    """Row/contraction tiles respecting the (8, 128) constraint."""
    # Contraction (K) tile: a multiple of 128 dividing N, else the full dim.
    if tile_k is None:
        if n % 128 == 0:
            tile_k = 512
            while n % tile_k:
                tile_k -= 128
        else:
            tile_k = n
    # Row tile: a multiple of 8 dividing N, else the full dim.  Prefer >= 2
    # row tiles so the "parallel" axis shards across both v7x TensorCores.
    if tile_n is None:
        if n % 8 == 0:
            tile_n = min(n, 256)
            while n % tile_n:
                tile_n -= 8
        else:
            tile_n = n
        if tile_n == n and n % 2 == 0 and (n // 2) % 8 == 0:
            tile_n = n // 2
    return tile_n, tile_k


def expert_forward(adj, x_enc, batch_unknown_nodes, w, b,
                   compute_dtype=jnp.bfloat16, tile_n=None, tile_k=None):
    """Pallas wrapper for Expert.forward(adj, x_enc, batch_unknown_nodes)."""
    B, N, F = x_enc.shape
    BF = B * F

    tile_n, tile_k = _pick_tiles(N, tile_n, tile_k)
    assert N % tile_n == 0 and N % tile_k == 0, (N, tile_n, tile_k)
    grid = (N // tile_n, N // tile_k)

    # ---- layout: fold batch into lanes (N, B*F) ----------------------------
    x_lane = jnp.transpose(x_enc, (1, 0, 2)).reshape(N, BF)
    x_agg = x_lane.astype(compute_dtype)          # MXU aggregation operand
    x_pass = x_lane.astype(jnp.float32)           # exact pass-through rows
    adj_c = adj.astype(compute_dtype)
    w_c = w.astype(compute_dtype)
    b_f = b.reshape(1, F).astype(jnp.float32)

    # Compact unknown-node mask (N, B); broadcast over F happens in-kernel.
    mask_nb = jnp.transpose(batch_unknown_nodes.reshape(B, N),
                            (1, 0)).astype(jnp.float32)

    # Precompute 1/deg once on the host-side graph (mean aggregation).
    deg = jnp.maximum(jnp.sum(adj.astype(jnp.float32), axis=-1, keepdims=True),
                      1.0)
    inv_deg = (1.0 / deg).astype(jnp.float32)     # (N, 1)

    # ---- explicit VMEM budget (double-buffered blocks + scratch) -----------
    csz = jnp.dtype(compute_dtype).itemsize
    vmem_bytes = (
        2 * tile_n * tile_k * csz       # adj tile
        + 2 * tile_k * BF * csz         # x (aggregation operand)
        + 2 * tile_n * 128 * 4          # inv_deg (lane-padded)
        + 2 * tile_n * 128 * 4          # mask (lane-padded)
        + 2 * tile_n * BF * 4           # pass-through x rows
        + 2 * F * F * csz               # W
        + 2 * 8 * F * 4                 # bias (sublane-padded)
        + 2 * tile_n * BF * 4           # output tile
        + tile_n * BF * 4               # f32 accumulator scratch
    )
    try:
        vmem_cap = int(pltpu.get_tpu_info().vmem_capacity_bytes)
    except Exception:
        vmem_cap = 64 << 20             # conservative (v7x per-core VMEM)
    vmem_limit = int(vmem_bytes * 1.25) + (1 << 20)
    vmem_limit = max(vmem_limit, 16 << 20)
    vmem_limit = min(vmem_limit, int(vmem_cap * 0.9))

    kernel = functools.partial(completion_kernel, batch=B, feat=F)

    out_f = pl.pallas_call(
        kernel,
        out_shape=jax.ShapeDtypeStruct((N, BF), jnp.float32),
        grid_spec=pltpu.PrefetchScalarGridSpec(
            num_scalar_prefetch=0,
            grid=grid,
            in_specs=[
                pl.BlockSpec((tile_n, tile_k), lambda i, k: (i, k)),  # adj
                pl.BlockSpec((tile_k, BF), lambda i, k: (k, 0)),      # x (agg)
                pl.BlockSpec((tile_n, 1), lambda i, k: (i, 0)),       # 1/deg
                pl.BlockSpec((tile_n, B), lambda i, k: (i, 0)),       # mask
                pl.BlockSpec((tile_n, BF), lambda i, k: (i, 0)),      # x pass
                pl.BlockSpec((F, F), lambda i, k: (0, 0)),            # W
                pl.BlockSpec((1, F), lambda i, k: (0, 0)),            # bias
            ],
            out_specs=pl.BlockSpec((tile_n, BF), lambda i, k: (i, 0)),
            scratch_shapes=[pltpu.VMEM((tile_n, BF), jnp.float32)],
        ),
        compiler_params=pltpu.CompilerParams(
            dimension_semantics=("parallel", "arbitrary"),
            vmem_limit_bytes=vmem_limit,
        ),
    )(adj_c, x_agg, inv_deg, mask_nb, x_pass, w_c, b_f)

    # Unfold lanes: (N, B*F) -> (B, N, F).
    return jnp.transpose(out_f.reshape(N, B, F), (1, 0, 2)).astype(x_enc.dtype)


def expert_reference(adj, x_enc, batch_unknown_nodes, w, b):
    """Pure-JAX reference (mean aggregation, linear + relu, masked select)."""
    B, N, _ = x_enc.shape
    deg = jnp.maximum(jnp.sum(adj, axis=-1, keepdims=True), 1.0)      # (N, 1)
    agg = jnp.einsum("nm,bmf->bnf", adj, x_enc) / deg[None, :, :]
    h = jnp.maximum(agg @ w + b, 0.0)
    mask = batch_unknown_nodes.reshape(B, N).astype(bool)[..., None]
    return jnp.where(mask, h, x_enc)


def expert_reference_lowprec(adj, x_enc, batch_unknown_nodes, w, b, dtype):
    """Reference matching the kernel's low-precision rounding points."""
    B, N, _ = x_enc.shape
    f32 = jnp.float32
    adj_r = adj.astype(dtype).astype(f32)
    x_r = x_enc.astype(dtype).astype(f32)
    w_r = w.astype(dtype).astype(f32)
    deg = jnp.maximum(jnp.sum(adj.astype(f32), axis=-1, keepdims=True), 1.0)
    agg = jnp.einsum("nm,bmf->bnf", adj_r, x_r) / deg[None, :, :]
    agg = agg.astype(dtype).astype(f32)
    h = jnp.maximum(agg @ w_r + b, 0.0)
    mask = batch_unknown_nodes.reshape(B, N).astype(bool)[..., None]
    return jnp.where(mask, h, x_enc)   # pass-through stays exact f32


if __name__ == "__main__":
    B, N, F = 2, 16, 128   # B*F = 256 -> lane-dense (2 x 128-lane) output

    key = jax.random.PRNGKey(0)
    k_adj, k_x, k_mask, k_w, k_b = jax.random.split(key, 5)

    # Symmetric binary adjacency with self-loops.
    adj_raw = (jax.random.uniform(k_adj, (N, N)) > 0.7).astype(jnp.float32)
    adj = jnp.clip(adj_raw + adj_raw.T + jnp.eye(N, dtype=jnp.float32), 0.0, 1.0)

    x_enc = jax.random.normal(k_x, (B, N, F), dtype=jnp.float32)
    batch_unknown_nodes = (jax.random.uniform(k_mask, (B, N)) > 0.5).astype(jnp.float32)

    # Deterministic completion-expert parameters (synthetic init).
    w = jax.random.normal(k_w, (F, F), dtype=jnp.float32) * 0.1
    b = jax.random.normal(k_b, (F,), dtype=jnp.float32) * 0.01

    # --- default bf16 MXU path (f32 accumulation / epilogue) ---------------
    out_bf16 = jax.block_until_ready(
        expert_forward(adj, x_enc, batch_unknown_nodes, w, b))
    ref_bf16 = expert_reference_lowprec(adj, x_enc, batch_unknown_nodes, w, b,
                                        jnp.bfloat16)
    assert out_bf16.shape == (B, N, F)
    assert jnp.allclose(out_bf16, ref_bf16, atol=3e-2, rtol=3e-2), \
        float(jnp.max(jnp.abs(out_bf16 - ref_bf16)))

    # --- explicit f32 path ---------------------------------------------------
    out_f32 = jax.block_until_ready(
        expert_forward(adj, x_enc, batch_unknown_nodes, w, b,
                       compute_dtype=jnp.float32))
    ref_f32 = expert_reference(adj, x_enc, batch_unknown_nodes, w, b)
    assert out_f32.shape == (B, N, F)
    assert jnp.allclose(out_f32, ref_f32, atol=1e-2, rtol=1e-2), \
        float(jnp.max(jnp.abs(out_f32 - ref_f32)))

    # TODO(synk): the original Expert dispatches to an arbitrary `completion`
    # nn.Module; only a GCN-style mean-aggregation completion is implemented here.
    print("KERNEL_OK")
</pallas_src>

<mosaic_0001>
module attributes {stable_mosaic.version = 11 : i64} {
  func.func @completion_kernel(%arg0: i32, %arg1: i32, %arg2: memref<8x16xbf16, #tpu.memory_space<vmem>>, %arg3: memref<16x256xbf16, #tpu.memory_space<vmem>>, %arg4: memref<8x1xf32, #tpu.memory_space<vmem>>, %arg5: memref<8x2xf32, #tpu.memory_space<vmem>>, %arg6: memref<8x256xf32, #tpu.memory_space<vmem>>, %arg7: memref<128x128xbf16, #tpu.memory_space<vmem>>, %arg8: memref<1x128xf32, #tpu.memory_space<vmem>>, %arg9: memref<8x256xf32, #tpu.memory_space<vmem>>, %arg10: memref<8x256xf32, #tpu.memory_space<vmem>>) attributes {dimension_semantics = [#tpu.dimension_semantics<parallel>, #tpu.dimension_semantics<arbitrary>], iteration_bounds = array<i64: 2, 1>, scalar_prefetch = 0 : i64, scratch_operands = 1 : i64, tpu.core_type = #tpu.core_type<tc>, window_params = [{transform_indices = @transform_0, window_bounds = array<i64: 8, 16>}, {transform_indices = @transform_1, window_bounds = array<i64: 16, 256>}, {transform_indices = @transform_2, window_bounds = array<i64: 8, 1>}, {transform_indices = @transform_3, window_bounds = array<i64: 8, 2>}, {transform_indices = @transform_4, window_bounds = array<i64: 8, 256>}, {pipeline_mode = #tpu.pipeline_mode<synchronous>, transform_indices = @transform_5, window_bounds = array<i64: 128, 128>}, {pipeline_mode = #tpu.pipeline_mode<synchronous>, transform_indices = @transform_6, window_bounds = array<i64: 1, 128>}, {transform_indices = @transform_7, window_bounds = array<i64: 8, 256>}]} {
    %c0_i32 = arith.constant 0 : i32
    %0 = arith.cmpi eq, %arg1, %c0_i32 : i32
    %1 = arith.extui %0 : i1 to i32
    %c0_i32_0 = arith.constant 0 : i32
    %2 = arith.cmpi ne, %1, %c0_i32_0 : i32
    scf.if %2 {
      %cst_10 = arith.constant 0.000000e+00 : f32
      %12 = vector.broadcast %cst_10 : f32 to vector<8x256xf32>
      %c0_11 = arith.constant 0 : index
      %c0_12 = arith.constant 0 : index
      %13 = vector.load %arg10[%c0_11, %c0_12] : memref<8x256xf32, #tpu.memory_space<vmem>>, vector<8x256xf32>
      tpu.vector_store %arg10[%c0_11, %c0_12], %12 {strides = array<i32>} : memref<8x256xf32, #tpu.memory_space<vmem>>, vector<8x256xf32>,
    } else {
    }
    %c0 = arith.constant 0 : index
    %c0_1 = arith.constant 0 : index
    %3 = vector.load %arg10[%c0, %c0_1] : memref<8x256xf32, #tpu.memory_space<vmem>>, vector<8x256xf32>
    %c0_2 = arith.constant 0 : index
    %c0_3 = arith.constant 0 : index
    %4 = vector.load %arg2[%c0_2, %c0_3] : memref<8x16xbf16, #tpu.memory_space<vmem>>, vector<8x16xbf16>
    %c0_4 = arith.constant 0 : index
    %c0_5 = arith.constant 0 : index
    %5 = vector.load %arg3[%c0_4, %c0_5] : memref<16x256xbf16, #tpu.memory_space<vmem>>, vector<16x256xbf16>
    %cst = arith.constant dense<0.000000e+00> : vector<8x256xf32>
    %6 = tpu.matmul %4, %5, %cst {dimension_numbers = #tpu.dot_dimension_numbers<[1], [0], [0], [1], [0, 0, 1, 1], [], []>} : vector<8x16xbf16>, vector<16x256xbf16>, vector<8x256xf32> -> vector<8x256xf32>
    %7 = arith.addf %3, %6 : vector<8x256xf32>
    %c0_6 = arith.constant 0 : index
    %c0_7 = arith.constant 0 : index
    %8 = vector.load %arg10[%c0_6, %c0_7] : memref<8x256xf32, #tpu.memory_space<vmem>>, vector<8x256xf32>
    tpu.vector_store %arg10[%c0_6, %c0_7], %7 {strides = array<i32>} : memref<8x256xf32, #tpu.memory_space<vmem>>, vector<8x256xf32>,
    %c0_i32_8 = arith.constant 0 : i32
    %9 = arith.cmpi eq, %arg1, %c0_i32_8 : i32
    %10 = arith.extui %9 : i1 to i32
    %c0_i32_9 = arith.constant 0 : i32
    %11 = arith.cmpi ne, %10, %c0_i32_9 : i32
    scf.if %11 {
      %c0_10 = arith.constant 0 : index
      %c0_11 = arith.constant 0 : index
      %12 = vector.load %arg10[%c0_10, %c0_11] : memref<8x256xf32, #tpu.memory_space<vmem>>, vector<8x256xf32>
      %c0_12 = arith.constant 0 : index
      %c0_13 = arith.constant 0 : index
      %13 = vector.load %arg4[%c0_12, %c0_13] : memref<8x1xf32, #tpu.memory_space<vmem>>, vector<8x1xf32>
      %14 = vector.broadcast %13 : vector<8x1xf32> to vector<8x256xf32>
      %15 = arith.mulf %12, %14 : vector<8x256xf32>
      %c0_14 = arith.constant 0 : index
      %c0_15 = arith.constant 0 : index
      %16 = vector.load %arg7[%c0_14, %c0_15] : memref<128x128xbf16, #tpu.memory_space<vmem>>, vector<128x128xbf16>
      %c0_16 = arith.constant 0 : index
      %c0_17 = arith.constant 0 : index
      %17 = vector.load %arg8[%c0_16, %c0_17] : memref<1x128xf32, #tpu.memory_space<vmem>>, vector<1x128xf32>
      %c0_18 = arith.constant 0 : index
      %c0_19 = arith.constant 0 : index
      %18 = vector.load %arg5[%c0_18, %c0_19] : memref<8x2xf32, #tpu.memory_space<vmem>>, vector<8x2xf32>
      %19 = vector.extract_strided_slice %15 {offsets = [0, 0], sizes = [8, 128], strides = [1, 1]} : vector<8x256xf32> to vector<8x128xf32>
      %20 = arith.truncf %19 : vector<8x128xf32> to vector<8x128xbf16>
      %cst_20 = arith.constant dense<0.000000e+00> : vector<8x128xf32>
      %21 = tpu.matmul %20, %16, %cst_20 {dimension_numbers = #tpu.dot_dimension_numbers<[1], [0], [0], [1], [0, 0, 1, 1], [], []>} : vector<8x128xbf16>, vector<128x128xbf16>, vector<8x128xf32> -> vector<8x128xf32>
      %22 = vector.broadcast %17 : vector<1x128xf32> to vector<8x128xf32>
      %23 = arith.addf %21, %22 : vector<8x128xf32>
      %cst_21 = arith.constant 0.000000e+00 : f32
      %24 = vector.broadcast %cst_21 : f32 to vector<8x128xf32>
      %25 = arith.maximumf %23, %24 : vector<8x128xf32>
      %26 = vector.extract_strided_slice %18 {offsets = [0, 0], sizes = [8, 1], strides = [1, 1]} : vector<8x2xf32> to vector<8x1xf32>
      %cst_22 = arith.constant 0.000000e+00 : f32
      %27 = vector.broadcast %cst_22 : f32 to vector<8x1xf32>
      %28 = arith.cmpf ogt, %26, %27 : vector<8x1xf32>
      %c0_23 = arith.constant 0 : index
      %c0_24 = arith.constant 0 : index
      %29 = vector.load %arg6[%c0_23, %c0_24] : memref<8x256xf32, #tpu.memory_space<vmem>>, vector<8x128xf32>
      %30 = vector.shape_cast %28 : vector<8x1xi1> to vector<8x1xi1>
      %31 = vector.broadcast %30 : vector<8x1xi1> to vector<8x128xi1>
      %32 = arith.select %31, %25, %29 : vector<8x128xi1>, vector<8x128xf32>
      %33 = vector.extract_strided_slice %15 {offsets = [0, 128], sizes = [8, 128], strides = [1, 1]} : vector<8x256xf32> to vector<8x128xf32>
      %34 = arith.truncf %33 : vector<8x128xf32> to vector<8x128xbf16>
      %cst_25 = arith.constant dense<0.000000e+00> : vector<8x128xf32>
      %35 = tpu.matmul %34, %16, %cst_25 {dimension_numbers = #tpu.dot_dimension_numbers<[1], [0], [0], [1], [0, 0, 1, 1], [], []>} : vector<8x128xbf16>, vector<128x128xbf16>, vector<8x128xf32> -> vector<8x128xf32>
      %36 = vector.broadcast %17 : vector<1x128xf32> to vector<8x128xf32>
      %37 = arith.addf %35, %36 : vector<8x128xf32>
      %cst_26 = arith.constant 0.000000e+00 : f32
      %38 = vector.broadcast %cst_26 : f32 to vector<8x128xf32>
      %39 = arith.maximumf %37, %38 : vector<8x128xf32>
      %40 = vector.extract_strided_slice %18 {offsets = [0, 1], sizes = [8, 1], strides = [1, 1]} : vector<8x2xf32> to vector<8x1xf32>
      %cst_27 = arith.constant 0.000000e+00 : f32
      %41 = vector.broadcast %cst_27 : f32 to vector<8x1xf32>
      %42 = arith.cmpf ogt, %40, %41 : vector<8x1xf32>
      %c0_28 = arith.constant 0 : index
      %c128 = arith.constant 128 : index
      %43 = vector.load %arg6[%c0_28, %c128] : memref<8x256xf32, #tpu.memory_space<vmem>>, vector<8x128xf32>
      %44 = vector.shape_cast %42 : vector<8x1xi1> to vector<8x1xi1>
      %45 = vector.broadcast %44 : vector<8x1xi1> to vector<8x128xi1>
      %46 = arith.select %45, %39, %43 : vector<8x128xi1>, vector<8x128xf32>
      %47 = tpu.concatenate %32, %46 in 1 : vector<8x128xf32>, vector<8x128xf32> -> vector<8x256xf32>
      %c0_29 = arith.constant 0 : index
      %c0_30 = arith.constant 0 : index
      %48 = vector.load %arg9[%c0_29, %c0_30] : memref<8x256xf32, #tpu.memory_space<vmem>>, vector<8x256xf32>
      tpu.vector_store %arg9[%c0_29, %c0_30], %47 {strides = array<i32>} : memref<8x256xf32, #tpu.memory_space<vmem>>, vector<8x256xf32>,
    } else {
    }
    return
  }
  func.func @transform_0(%arg0: i32, %arg1: i32) -> (i32, i32) {
    %c0_i32 = arith.constant 0 : i32
    return %arg0, %arg1 : i32, i32
  }
  func.func @transform_1(%arg0: i32, %arg1: i32) -> (i32, i32) {
    %c0_i32 = arith.constant 0 : i32
    %c0_i32_0 = arith.constant 0 : i32
    return %arg1, %c0_i32 : i32, i32
  }
  func.func @transform_2(%arg0: i32, %arg1: i32) -> (i32, i32) {
    %c0_i32 = arith.constant 0 : i32
    %c0_i32_0 = arith.constant 0 : i32
    return %arg0, %c0_i32 : i32, i32
  }
  func.func @transform_3(%arg0: i32, %arg1: i32) -> (i32, i32) {
    %c0_i32 = arith.constant 0 : i32
    %c0_i32_0 = arith.constant 0 : i32
    return %arg0, %c0_i32 : i32, i32
  }
  func.func @transform_4(%arg0: i32, %arg1: i32) -> (i32, i32) {
    %c0_i32 = arith.constant 0 : i32
    %c0_i32_0 = arith.constant 0 : i32
    return %arg0, %c0_i32 : i32, i32
  }
  func.func @transform_5(%arg0: i32, %arg1: i32) -> (i32, i32) {
    %c0_i32 = arith.constant 0 : i32
    %c0_i32_0 = arith.constant 0 : i32
    %c0_i32_1 = arith.constant 0 : i32
    return %c0_i32, %c0_i32_0 : i32, i32
  }
  func.func @transform_6(%arg0: i32, %arg1: i32) -> (i32, i32) {
    %c0_i32 = arith.constant 0 : i32
    %c0_i32_0 = arith.constant 0 : i32
    %c0_i32_1 = arith.constant 0 : i32
    return %c0_i32, %c0_i32_0 : i32, i32
  }
  func.func @transform_7(%arg0: i32, %arg1: i32) -> (i32, i32) {
    %c0_i32 = arith.constant 0 : i32
    %c0_i32_0 = arith.constant 0 : i32
    return %arg0, %c0_i32 : i32, i32
  }
}

</mosaic_0001>

<bundles_post_ra>
// kernel: tpu_custom_call.1
= control target key start
LH: loop header
LB: loop body
LE: loop exit
PB: predicated region body
PF: predicated region fallthrough
CT: control target
= control target key end

     0   :  { %s1434_s0 = inlined_call_operand.hbm [shape: bf16[16,16], index: 0, kind: input, shape index: {}]   ;;  %s1435_s1 = inlined_call_operand.vmem [shape: bf16[16,256], index: 1, kind: input, shape index: {}]   ;;  %s1436_s2 = inlined_call_operand.vmem [shape: f32[16,1], index: 2, kind: input, shape index: {}]   ;;  %s1437_s3 = inlined_call_operand.vmem [shape: f32[16,2], index: 3, kind: input, shape index: {}]   ;;  %s1438_s4 = inlined_call_operand.vmem [shape: f32[16,256], index: 4, kind: input, shape index: {}]   ;;  %s1439_s5 = inlined_call_operand.hbm [shape: bf16[128,128], index: 5, kind: input, shape index: {}]   ;;  %s1440_s6 = inlined_call_operand.vmem [shape: f32[1,128], index: 6, kind: input, shape index: {}]   ;;  %s1441_s7 = inlined_call_operand.hbm [shape: f32[16,256], index: 7, kind: output, shape index: {}]  }
   0x1   :  { %1447 = sst [smem:[#allocation13_spill]] %s1439_s5 }
   0x2   :  { %12 = vsyncpa [#allocation4], 0 }
   0x3   :  { %14 = vsyncpa [#allocation4 + $0x1], 0 }
   0x4   :  { %15 = vsyncpa [#allocation7], 0 }
   0x5   :  { %16 = vsyncpa [#allocation5], 0 }
   0x6   :  { %18 = vsyncpa [#allocation5 + $0x1], 0  ;;  %s1195_s24 = smov 0   ;;  %s1197_s25 = smov 0  }
   0x7   :  { %s1199_s26 = smov 0   ;;  %s1201_s27 = smov 0  }
   0x8   :  { %s1203_s28 = smov 0   ;;  %s1205_s29 = smov 0  }
   0x9 LB: > { %s814_s30 = sadd.s32 4294967295, %s1144_s29   ;;  %s815_s8 = sadd.s32 4294967294, %s1144_s29   ;;  %s1144_s29 = sphi %s1205_s29, %s24_s29   ;;  %s1140_s28 = sphi %s1203_s28, %s1470_s28   ;;  %s1136_s27 = sphi %s1201_s27, %s1469_s27   ;;  %s1132_s26 = sphi %s1199_s26, %s1468_s26   ;;  %s1128_s25 = sphi %s1197_s25, %s1467_s25   ;;  %s1124_s24 = sphi %s1195_s24, %s1466_s24  }
   0xa   : > { %p58_p0 = scmp.ne.s32.totalorder %s1128_s25, %s1124_s24  ;;  %p1229_p1 = scmp.eq.s32.totalorder %s814_s30, 0 }
   0xb   : > { %p1233_p2 = scmp.eq.s32.totalorder %s814_s30, 1  ;;  %p234_p3 = scmp.eq.s32.totalorder %s815_s8, 1 }
   0xc   : > { %s1448_s9 = scalar_select %p1229_p1, 1, 0 }
   0xd   : > { %s1449_s10 = scalar_select %p1233_p2, 1, 0 }
   0xe   : > { %p1239_p4 = por %p1229_p1, %p58_p0  ;;  %p816_p5 = scmp.ge.s32.totalorder %s1144_s29, 1 }
   0xf   : > { %p1244_p6 = por %p234_p3, %p58_p0  ;;  %p241_p7 = scmp.lt.s32.totalorder %s1144_s29, 3 }
  0x10   : > { %s1450_s11 = scalar_select %p1239_p4, 1, 0 }
  0x11   : > { %s1451_s12 = scalar_select %p1244_p6, 1, 0 }
  0x12   : > { %p1249_p8 = pnand %p816_p5, %p241_p7  ;;  %s1146_s14 = smov [#allocation6]  }
  0x13   : > { %s263_s15 = sshll.u32 %s1146_s14, 4  ;;  %s36_s17 = sadd.s32 1, %s1140_s28  ;;  %s264_s15 = int_to_ptr.vmem [resolvable:$true] %s263_s15 }
  0x14   : > { %s1452_s13 = scalar_select %p1249_p8, 1, 0 }
  0x15   : > { %p915_p9 = pneg %p1249_p8  ;;  %s1454_s5 = sld [smem:[#allocation13_spill]] }
  0x17   : > { %p1258_p11 = pnand %p915_p9, %p1229_p1 }
  0x19   : > { %p1002_p13 = pneg %p1258_p11 }
  0x1b   : > { %s1000_s20 = scalar_lea.hbm %s1454_s5, 1024 }
  0x1c   : > { %p1001_p12 = scmp.ne.s32.totalorder %s1454_s5, %s1000_s20  ;;  %p1007_p5 = scmp.lt.u32.totalorder %s1000_s20, %s1454_s5 }
  0x1e   : > { %p1003_p0 = pnand %p1002_p13, %p1001_p12 }
  0x20   : > { %p1004_p3 = pneg %p1003_p0 }
  0x22   : > { %p1009_p7 = pnand %p1007_p5, %p1004_p3 }
  0x24   : > { %1012 = shalt.err (!%p1009_p7)
}
  0x25   : > { %s1013_s8 = scalar_lea.vmem %s264_s15, 1024  ;;  %p1021_p1 = scmp.lt.s32.totalorder %s264_s15, %s264_s15 }
  0x26   : > { %p1014_p9 = scmp.ne.s32.totalorder %s264_s15, %s1013_s8  ;;  %p1022_p4 = scmp.lt.s32.totalorder %s1013_s8, %s1013_s8 }
  0x28   : > { %p1016_p10 = pnand %p1014_p9, %p1002_p13  ;;  %p1023_p8 = por %p1022_p4, %p1021_p1 }
  0x2a   : > { %p1017_p6 = pneg %p1016_p10 }
  0x2c   : > { %p1024_p2 = pnand %p1023_p8, %p1017_p6 }
  0x2e   : > { %1027 = shalt.err (!%p1024_p2)
}
  0x2f   : > { %s1147_s14 = smov 64   ;;  %s1148_s18 = smov 4  }
  0x30   : > { %918 = dma.hbm_to_vmem [thread:$0]  (!%p1258_p11), %s1454_s5, 1024, %s264_s15, [#allocation7], %s1147_s14, %s1147_s14, %s1148_s18  }
  0x31   : > { %p38_p1 = scmp.ge.s32.totalorder %s36_s17, 2  ;;  %s45_s21 = sadd.s32 1, %s1132_s26 }
  0x32   : > { %p52_p2 = scmp.ne.s32.totalorder %s1132_s26, %s1128_s25  ;;  %p53_p4 = scmp.eq.s32.totalorder %s1144_s29, 0 }
  0x33   : > { %s1472_s17 = smov (%p38_p1, %s36_s17), 0  ;;  %p1457_p8 = scmp.ne.s32.totalorder %s1449_s10, 0 }
  0x34   : > { %1455 = sst [smem:[#allocation12_spill]] %s1472_s17  ;;  %p1285_p6 = por %p53_p4, %p52_p2 }
  0x35   : > { %p1291_p10 = por %p1457_p8, %p52_p2  ;;  %s40_s16 = ssub.s32 %s1140_s28, %s1472_s17 }
  0x36   : > { %p928_p12 = scmp.lt.s32.totalorder %s1144_s29, 2  ;;  %p43_p11 = scmp.eq.s32.totalorder %s40_s16, 0 }
  0x37   : > { %s280_s15 = sand.u32 1, %s1132_s26   ;;  %s821_s14 = sshll.u32 %s1140_s28, 6 }
  0x38   : > { %s820_s30 = sshll.u32 %s280_s15, 2  ;;  %s1306_s20 = scalar_lea.hbm %s1434_s0, %s821_s14 }
  0x39   : > { %s1300_s8 = scalar_select %p43_p11, %s1132_s26, %s45_s21  }
  0x3a   : > { %s284_s10 = scalar_lea.vmem [#allocation3], %s820_s30  ;;  %p1312_p13 = pnand %p928_p12, %p1285_p6 }
  0x3b   : > { %s292_s5 = sshll.u32 %s284_s10, 4  ;;  %s281_s21 = scalar_lea.sflag [#allocation4], %s280_s15  ;;  %s1308_s5 = int_to_ptr.vmem [resolvable:$true] %s292_s5 }
  0x3c   : > { %s1028_s17 = scalar_lea.hbm %s1306_s20, 64  ;;  %p1030_p3 = pneg %p1312_p13 }
  0x3d   : > { %p1029_p0 = scmp.ne.s32.totalorder %s1306_s20, %s1028_s17  ;;  %s1033_s18 = scalar_lea.hbm %s1434_s0, 128 }
  0x3e   : > { %p1034_p9 = scmp.lt.u32.totalorder %s1306_s20, %s1434_s0  ;;  %p1035_p1 = scmp.lt.u32.totalorder %s1033_s18, %s1028_s17 }
  0x3f   : > { %p1031_p5 = pnand %p1030_p3, %p1029_p0  ;;  %p1037_p4 = scmp.lt.u32.totalorder %s1028_s17, %s1306_s20 }
  0x40   : > { %p1036_p2 = por %p1035_p1, %p1034_p9 }
  0x41   : > { %p1032_p7 = pneg %p1031_p5 }
  0x42   : > { %p1038_p6 = por %p1037_p4, %p1036_p2 }
  0x44   : > { %p1039_p8 = pnand %p1038_p6, %p1032_p7 }
  0x46   : > { %1042 = shalt.err (!%p1039_p8)
}
  0x47   : > { %s1043_s15 = scalar_lea.vmem %s1308_s5, 64  ;;  %s1149_s10 = smov [#allocation3]  }
  0x48   : > { %p1044_p12 = scmp.ne.s32.totalorder %s1308_s5, %s1043_s15  ;;  %s1048_s30 = sshll.u32 %s1149_s10, 4  ;;  %s1049_s30 = int_to_ptr.vmem [resolvable:$false] %s1048_s30 }
  0x49   : > { %s1050_s14 = scalar_lea.vmem %s1049_s30, 128  ;;  %p1051_p5 = scmp.lt.s32.totalorder %s1308_s5, %s1049_s30 }
  0x4a   : > { %p1046_p11 = pnand %p1044_p12, %p1030_p3  ;;  %p1052_p9 = scmp.lt.s32.totalorder %s1050_s14, %s1043_s15 }
  0x4c   : > { %p1047_p0 = pneg %p1046_p11  ;;  %p1053_p1 = por %p1052_p9, %p1051_p5 }
  0x4e   : > { %p1054_p2 = pnand %p1053_p1, %p1047_p0 }
  0x50   : > { %1057 = shalt.err (!%p1054_p2)
}
  0x51   : > { %922 = dma.hbm_to_vmem [thread:$0]  (!%p1312_p13), %s1306_s20, 64, %s1308_s5, %s281_s21  }
  0x52   : > { %p1460_p7 = scmp.ne.s32.totalorder %s1452_s13, 0 }
  0x53   : > { %s1344_s17 = sand.u32 (!%p1460_p7), 1, %s1128_s25   ;;  %p1461_p3 = scmp.ne.s32.totalorder (!%p1460_p7), %s1450_s11, 0 }
  0x54   : > { %323 = sbr.rel (%p1460_p7) target bundleno = 549 (0x225), region = 48  ;;  %s823_s18 = sshll.u32 (!%p1460_p7), %s1344_s17, 2 }
  0x55   : > { %s326_s22 = scalar_lea.sflag (!%p1460_p7), [#allocation4], %s1344_s17  ;;  %s329_s19 = scalar_lea.vmem (!%p1460_p7), [#allocation3], %s823_s18 }
  0x5b   : > { %1111 = dma.done.wait (%p1461_p3), %s326_s22, 64  }
  0x5c   : > { %1113 = vsyncadd (%p1461_p3), %s326_s22, 4294967232  ;;  %p1462_p4 = scmp.ne.s32.totalorder %s1448_s9, 0 }
  0x5e   : > { %1115 = dma.done.wait (%p1462_p4), [#allocation7], 1024  }
  0x5f   : > { %1117 = vsyncadd (%p1462_p4), [#allocation7], 4294966272  ;;  %p390_p13 = scmp.lt.s32.totalorder %s1136_s27, 1  ;;  %v1150_v0 = vmov 0   ;;  %v1151_v1 = vmov 0.0   ;;  %vm425_vm0 = vcmask 130048  }
  0x60   : > { %461 = vmatprep.mubr.bf16.mxu0 %v1150_v0  ;;  %986 = vset.pattern.permute.xlu0 %v1150_v0  ;;  %v989_v2 = vld [vmem:[%s1435_s1 + $0x4] ss:$8 sps:$4 sm:$0xff]   ;;  %v991_v3 = vld [vmem:[%s1435_s1] ss:$8 sps:$4 sm:$0xff]   ;;  %v993_v9 = vld [vmem:[#allocation6 + $0x8] sm:$0xff]   ;;  %vm1152_vm2 = vmmov 0  }
  0x61   : > { %s1358_s5 = scalar_select %p390_p13, %s1136_s27, 1  ;;  %867 = vmatprep.subr.bf16.mxu1 %v1151_v1  ;;  %v412_v4 = vld [vmem:[%s329_s19] sm:$0xf]  ;;  %429 = vmatprep.subr.bf16.mxu0 %v989_v2  ;;  %v992_v7 = vld [vmem:[#allocation6] sm:$0xff]   ;;  %v994_v10 = vld [vmem:[#allocation6 + $0x10] sm:$0xff]   ;;  %v1153_v16 = vmov 1  }
  0x62   : > { %430 = vmatpush1.bf16.msra.mxu0 %v991_v3  ;;  %868 = vmatpush3.bf16.msra.mxu1 %v992_v7  ;;  %v995_v11 = vld [vmem:[#allocation6 + $0x18] sm:$0xff]   ;;  %v996_v12 = vld [vmem:[#allocation6 + $0x20] sm:$0xff]   ;;  %v997_v13 = vld [vmem:[#allocation6 + $0x28] sm:$0xff]   ;;  %s825_s22 = sshll.u32 %s1344_s17, 4  ;;  %s848_s15 = sshll.u32 %s1136_s27, 8 }
  0x63   : > { %s826_s13 = sshll.u32 %s1358_s5, 3  ;;  %887 = vmatprep.subr.bf16.mxu0 %v1151_v1  ;;  %869 = vmatprep.subr.bf16.mxu1 %v1151_v1  ;;  %v998_v14 = vld [vmem:[#allocation6 + $0x30] sm:$0xff]   ;;  %v999_v15 = vld [vmem:[#allocation6 + $0x38] sm:$0xff]   ;;  %s847_s19 = sshll.u32 %s1358_s5, 4 }
  0x64   : > { %s393_s16 = scalar_lea.vmem %s1436_s2, %s826_s13  ;;  %s397_s9 = scalar_lea.vmem %s1437_s3, %s826_s13  ;;  %883 = vmatprep.mubr.msk.bf16.mxu1 %vm1152_vm2, %v1151_v1  ;;  %987 = vset.pattern.permute.xlu1 %v1153_v16  ;;  %v833_v26 = vld [vmem:[%s1440_s6] ss:$0 sm:$0xff] }
  0x65   : > { %v479_v5 = vld [vmem:[%s393_s16] sm:$0xff]  ;;  %832 = vmatmul.mubr.msk.bf16.vlgmr.msra.gmra.mrb[0].mxu0 %vm425_vm0, %v412_v4  ;;  %s402_s21 = scalar_lea.vmem %s1438_s4, %s847_s19  ;;  %s382_s5 = scalar_lea.vmem [#allocation8], %s825_s22 }
  0x66   : > { %482 = vperm.xlu0 %986, %v479_v5   ;;  %v504_v6 = vld [vmem:[%s397_s9] sm:$0xff]  ;;  %888 = vmatpush3.bf16.msra.mxu0 %v992_v7  ;;  %s674_s9 = sshll.u32 %s382_s5, 4  ;;  %v651_v40 = vld [vmem:[%s402_s21 + $0x8] sm:$0xff]  ;;  %s1385_s14 = scalar_lea.hbm %s1441_s7, %s848_s15  ;;  %s1387_s9 = int_to_ptr.vmem [resolvable:$true] %s674_s9 }
  0x67   : > { %vm601_vm1 = vcmp.gt.f32.partialorder %v504_v6, 0.0  ;;  %889 = vmatprep.subr.bf16.mxu0 %v1151_v1  ;;  %870 = vmatpush3.bf16.msra.mxu1 %v993_v9  ;;  %v602_v36 = vld [vmem:[%s402_s21] sm:$0xff]  ;;  %s660_s27 = scalar_lea.sflag [#allocation5], %s1344_s17  ;;  %s1058_s18 = scalar_lea.vmem %s1387_s9, 256 }
  0x68   : > { %v603_v8 = vsel %vm601_vm1, 1, %v1150_v0  ;;  %871 = vmatprep.subr.bf16.mxu1 %v1151_v1  ;;  %903 = vmatprep.mubr.msk.bf16.mxu0 %vm1152_vm2, %v1151_v1  ;;  %p1059_p6 = scmp.ne.s32.totalorder %s1387_s9, %s1058_s18  ;;  %s1154_s22 = smov [#allocation8]  }
  0x69   : > { %653 = vperm.xlu1 %987, %v603_v8   ;;  %s1062_s19 = sshll.u32 %s1154_s22, 4  ;;  %s1063_s19 = int_to_ptr.vmem [resolvable:$false] %s1062_s19 }
  0x6a   : > { %605 = vperm.xlu0 %986, %v603_v8   ;;  %890 = vmatpush3.bf16.msra.mxu0 %v993_v9  ;;  %p1060_p8 = pnand %p1059_p6, %p1291_p10  ;;  %s1064_s13 = scalar_lea.vmem %s1063_s19, 512 }
  0x6b   : > { %891 = vmatprep.subr.bf16.mxu0 %v1151_v1  ;;  %872 = vmatpush3.bf16.msra.mxu1 %v994_v10  ;;  %p1065_p11 = scmp.lt.s32.totalorder %s1387_s9, %s1063_s19  ;;  %p1066_p0 = scmp.lt.s32.totalorder %s1064_s13, %s1058_s18 }
  0x6c   : > { %873 = vmatprep.subr.bf16.mxu1 %v1151_v1  ;;  %p1061_p12 = pneg %p1060_p8 }
  0x6d   : > { %p1067_p5 = por %p1066_p0, %p1065_p11 }
  0x6e   : > { %892 = vmatpush3.bf16.msra.mxu0 %v994_v10  ;;  %988 = vset.pattern.permute.xlu0 %v1153_v16 }
  0x6f   : > { %893 = vmatprep.subr.bf16.mxu0 %v1151_v1  ;;  %874 = vmatpush3.bf16.msra.mxu1 %v995_v11  ;;  %p1068_p9 = pnand %p1067_p5, %p1061_p12 }
  0x70   : > { %875 = vmatprep.subr.bf16.mxu1 %v1151_v1 }
  0x72   : > { %894 = vmatpush3.bf16.msra.mxu0 %v995_v11 }
  0x73   : > { %895 = vmatprep.subr.bf16.mxu0 %v1151_v1  ;;  %876 = vmatpush3.bf16.msra.mxu1 %v996_v12 }
  0x74   : > { %877 = vmatprep.subr.bf16.mxu1 %v1151_v1 }
  0x76   : > { %896 = vmatpush3.bf16.msra.mxu0 %v996_v12 }
  0x77   : > { %897 = vmatprep.subr.bf16.mxu0 %v1151_v1  ;;  %878 = vmatpush3.bf16.msra.mxu1 %v997_v13 }
  0x78   : > { %879 = vmatprep.subr.bf16.mxu1 %v1151_v1 }
  0x7a   : > { %898 = vmatpush3.bf16.msra.mxu0 %v997_v13 }
  0x7b   : > { %899 = vmatprep.subr.bf16.mxu0 %v1151_v1  ;;  %880 = vmatpush3.bf16.msra.mxu1 %v998_v14 }
  0x7c   : > { %881 = vmatprep.subr.bf16.mxu1 %v1151_v1 }
  0x7e   : > { %900 = vmatpush3.bf16.msra.mxu0 %v998_v14 }
  0x7f   : > { %901 = vmatprep.subr.bf16.mxu0 %v1151_v1  ;;  %882 = vmatpush3.bf16.msra.mxu1 %v999_v15 }
  0x82   : > { %902 = vmatpush3.bf16.msra.mxu0 %v999_v15 }
  0xe5   : > { %v483_v17 = vpop.permute.xlu0 %482 }
  0xe8   : > { %v654_v29 = vpop.permute.xlu1 %653 }
  0xe9   : > { %v606_v27 = vpop.permute.xlu0 %605  ;;  %vm655_vm3 = vcmp.eq.s32.totalorder %v654_v29, 1 }
  0xea   : > { %vm607_vm4 = vcmp.eq.s32.totalorder %v606_v27, 1 }
 0x138   : > { %v463_v18 = vpop.f32.mrb[0].mxu0 }
 0x139   : > { %v485_v19 = vmul.f32 %v483_v17, %v463_v18  ;;  %v465_v20 = vpop.f32.mrb[1].mxu0 }
 0x13a   : > { %v486_v21 = vmul.f32 %v483_v17, %v465_v20  ;;  %v467_v22 = vpop.f32.mrb[2].mxu0 }
 0x13b   : > { %v505_v23 = vpack.c.bf16 %v485_v19, %v485_v19  ;;  %v468_v24 = vpop.f32.mrb[3].mxu0 }
 0x13c   : > { %v609_v25 = vpack.c.bf16 %v486_v21, %v486_v21 }
 0x13d   : > { %884 = vmatmul.mubr.bf16.vlgmr.msra.gmra.mrb[0].mxu1 %v505_v23 }
 0x13e   : > { %904 = vmatmul.mubr.bf16.vlgmr.msra.gmra.mrb[4].mxu0 %v609_v25 }
 0x210   : > { %v594_v28 = vpop.f32.mrb[0].mxu1 }
 0x211   : > { %v595_v30 = vadd.f32 %v833_v26, %v594_v28  ;;  %v885_v31 = vpop.f32.mrb[1].mxu1  ;;  %v644_v32 = vpop.f32.mrb[4].mxu0 }
 0x212   : > { %v645_v33 = vadd.f32 %v833_v26, %v644_v32  ;;  %v597_v34 = vpop.f32.mrb[2].mxu1  ;;  %v905_v35 = vpop.f32.mrb[5].mxu0 }
 0x213   : > { %v600_v37 = vmax.f32 %v595_v30, 0.0  ;;  %v886_v38 = vpop.f32.mrb[3].mxu1  ;;  %v647_v39 = vpop.f32.mrb[6].mxu0 }
 0x214   : > { %v650_v41 = vmax.f32 %v645_v33, 0.0  ;;  %v906_v42 = vpop.f32.mrb[7].mxu0 }
 0x215   : > { %v608_v43 = vsel %vm607_vm4, %v600_v37, %v602_v36 }
 0x216   : > { %v656_v44 = vsel %vm655_vm3, %v650_v41, %v651_v40  ;;  %657 = vst [vmem:[%s382_s5] sm:$0xff] %v608_v43 }
 0x217   : > { %658 = vst [vmem:[%s382_s5 + $0x8] sm:$0xff] %v656_v44 }
 0x218   : > { %1071 = shalt.err (!%p1068_p9)
}
 0x219   : > { %s1072_s17 = scalar_lea.hbm %s1385_s14, 256  ;;  %s1076_s16 = scalar_lea.hbm %s1441_s7, 512 }
 0x21a   : > { %p1073_p1 = scmp.ne.s32.totalorder %s1385_s14, %s1072_s17  ;;  %p1077_p3 = scmp.lt.u32.totalorder %s1385_s14, %s1441_s7 }
 0x21b   : > { %p1078_p4 = scmp.lt.u32.totalorder %s1076_s16, %s1072_s17  ;;  %p1080_p6 = scmp.lt.u32.totalorder %s1072_s17, %s1385_s14 }
 0x21c   : > { %p1074_p2 = pnand %p1073_p1, %p1291_p10 }
 0x21d   : > { %p1079_p13 = por %p1078_p4, %p1077_p3 }
 0x21e   : > { %p1075_p7 = pneg %p1074_p2 }
 0x21f   : > { %p1081_p8 = por %p1080_p6, %p1079_p13 }
 0x221   : > { %p1082_p12 = pnand %p1081_p8, %p1075_p7 }
 0x223   : > { %1085 = shalt.err (!%p1082_p12)
}
 0x224   : > { %913 = dma.vmem_to_hbm [thread:$0]  (%p1291_p10), %s1387_s9, 256, %s1385_s14, %s660_s27  }
 0x225 PF: > { %s686_s5 = sand.u32 1, %s1124_s24   ;;  %p1463_p11 = scmp.ne.s32.totalorder %s1451_s12, 0 }
 0x226   : > { %p1464_p0 = scmp.ge.s32.totalorder %s1144_s29, 2  ;;  %s687_s10 = scalar_lea.sflag [#allocation5], %s686_s5 }
 0x228   : > { %p924_p5 = pnand %p1464_p0, %p1463_p11 }
 0x22a   : > { %1119 = dma.done.wait (!%p924_p5), %s687_s10, 256  }
 0x22b   : > { %1121 = vsyncadd (!%p924_p5), %s687_s10, 4294967040  ;;  %s24_s29 = sadd.s32 1, %s1144_s29   ;;  %s1465_s23 = sld [smem:[#allocation12_spill]] }
 0x22c   : > { %p21_p9 = scmp.ge.s32.totalorder %s24_s29, 4   ;;  %s1466_s24 = smov %s1128_s25 }
 0x22d   : > { %s1467_s25 = smov %s1132_s26  ;;  %s1468_s26 = smov %s1300_s8 }
 0x22e   : > { %s1469_s27 = smov %s1140_s28  ;;  %23 = sbr.rel (!%p21_p9) target bundleno = 9 (0x9), region = 117 }
 0x231   : > { %s1470_s28 = smov %s1465_s23 }
 0x235   :  { %692 = vsyncpa [#allocation4], 1 }
 0x236   :  { %694 = vsyncpa [#allocation4 + $0x1], 1 }
 0x237   :  { %695 = vsyncpa [#allocation7], 1 }
 0x238   :  { %696 = vsyncpa [#allocation5], 1 }
 0x239   :  { %698 = vsyncpa [#allocation5 + $0x1], 1 }

</bundles_post_ra>
